<compile_context>
chip_gen: v5e
topology: v5e:2x2
jax: 0.10.0
libtpu: 0.0.40
codegen_flags: <defaults>
</compile_context>

<pallas_src>
import functools

import jax
import jax.numpy as jnp
from jax.experimental import pallas as pl
from jax.experimental.pallas import tpu as pltpu


def _round_up(x, m):
    return ((x + m - 1) // m) * m


# ---------------------------------------------------------------------------
# Kernel
# ---------------------------------------------------------------------------
def _nll_kernel(pred_ref, gold_ref, loss_ref, correct_ref,
                loss_acc, correct_acc, *, batch):
    """pred_ref: (TB, C) log-probs (native dtype); gold_ref: (TB, 1) int32.

    loss_ref / correct_ref: (1,1) SMEM scalar outputs (written on last step).
    loss_acc: (8, C) f32 VMEM accumulator; correct_acc: (8, 1) i32 VMEM acc.
    """
    step = pl.program_id(0)

    # Zero the resident VMEM accumulators on the first grid step.
    @pl.when(step == 0)
    def _init():
        loss_acc[...] = jnp.zeros_like(loss_acc)
        correct_acc[...] = jnp.zeros_like(correct_acc)

    pred = pred_ref[...]                  # (TB, C), native dtype (exact compares)
    gold = gold_ref[...]                  # (TB, 1), int32
    TB, C = pred.shape

    col = jax.lax.broadcasted_iota(jnp.int32, (TB, C), 1)
    row = jax.lax.broadcasted_iota(jnp.int32, (TB, 1), 0)
    # Mask the ragged tail of the last block: rows past the true batch size
    # contain garbage read past the array end and must contribute nothing.
    valid = (step * TB + row) < batch     # (TB, 1) bool

    # --- NLL gather: select pred[i, gold[i]], zero elsewhere / invalid rows.
    # where-select (not one-hot multiply) -> no 0 * (-inf) NaN hazard, and
    # garbage rows never enter any arithmetic.
    hit = jnp.logical_and(col == gold, valid)                       # (TB, C)
    picked = jnp.where(hit, pred, jnp.zeros_like(pred))             # native dtype
    # Fold (TB, C) -> (8, C) with pure vreg-wise VPU adds (no XLU, no scalar
    # path per step); upcast to f32 only for the accumulating sum.
    loss_acc[...] += jnp.sum(
        picked.reshape(TB // 8, 8, C).astype(jnp.float32), axis=0)

    # --- pick_label: argmax over classes, first index on ties (torch/numpy).
    row_max = jnp.max(pred, axis=-1, keepdims=True)                 # (TB, 1)
    idx_or_big = jnp.where(pred == row_max, col, jnp.int32(C))
    pred_label = jnp.min(idx_or_big, axis=-1, keepdims=True)        # (TB, 1) i32
    match = jnp.logical_and(pred_label == gold, valid).astype(jnp.int32)
    correct_acc[...] += jnp.sum(match.reshape(TB // 8, 8, 1), axis=0)

    # --- Single scalar reduction + SMEM write, only on the last grid step.
    @pl.when(step == pl.num_programs(0) - 1)
    def _finalize():
        loss_ref[0, 0] = -jnp.sum(loss_acc[...])
        correct_ref[0, 0] = jnp.sum(correct_acc[...])


# ---------------------------------------------------------------------------
# Tiling / VMEM budgeting
# ---------------------------------------------------------------------------
_SUBLANE_MULT = {4: 8, 2: 16, 1: 32}     # itemsize -> packed sublane multiple
_TB_CAP = 1024                            # per-step overhead already amortized


def _vmem_limit_bytes():
    """Scoped-VMEM limit request, generation-aware but conservative."""
    try:
        cap = int(pltpu.get_tpu_info().vmem_capacity_bytes)
    except Exception:
        cap = 64 * 1024 * 1024            # assume the smallest (v7x per-TC)
    # Use at most half of physical VMEM, never below the v6e/v7x 32 MiB
    # scoped default, never above 96 MiB even on 128 MiB parts.
    return int(min(max(cap // 2, 32 * 1024 * 1024), 96 * 1024 * 1024))


def _choose_tb(B, C, itemsize, pred_budget_bytes):
    sub = _SUBLANE_MULT.get(itemsize, 8)
    c_pad = _round_up(max(C, 1), 128)                 # lane padding of the tile
    tb = pred_budget_bytes // (2 * c_pad * itemsize)  # double-buffered pred block
    tb = min(tb, _TB_CAP, _round_up(B, sub))
    tb = max(sub, (tb // sub) * sub)
    return int(tb)


# ---------------------------------------------------------------------------
# Wrapper
# ---------------------------------------------------------------------------
def multiclass_loss(pred, gold, *, tb=None):
    """pred: (B, C) log-probs (any float dtype); gold: (B,) int labels.

    Returns (loss_scalar_f32, num_correct_scalar_i32).
    Note: out-of-range gold values (e.g. gold >= C or negative) silently
    contribute 0 to both loss and num_correct.
    """
    B, C = pred.shape
    gold2d = gold.astype(jnp.int32).reshape(B, 1)
    itemsize = int(jnp.dtype(pred.dtype).itemsize)

    vmem_limit = _vmem_limit_bytes()
    # Reserve headroom for the gold double-buffer, accumulators and compiler
    # internal scratch.
    pred_budget = max(4 * 1024 * 1024, vmem_limit - 8 * 1024 * 1024)

    if tb is not None:
        TB = max(8, _round_up(int(tb), 8))
    else:
        TB = _choose_tb(B, C, itemsize, pred_budget)
    nsteps = pl.cdiv(B, TB)               # ragged tail masked in-kernel (no pad)

    cost = pl.CostEstimate(
        flops=int(6 * B * C),
        transcendentals=0,
        bytes_accessed=int(B * C * itemsize + B * 4 + 8),
    )

    kernel = functools.partial(_nll_kernel, batch=B)

    loss, correct = pl.pallas_call(
        kernel,
        out_shape=(
            jax.ShapeDtypeStruct((1, 1), jnp.float32),
            jax.ShapeDtypeStruct((1, 1), jnp.int32),
        ),
        grid=(nsteps,),
        in_specs=[
            pl.BlockSpec((TB, C), lambda i: (i, 0)),
            pl.BlockSpec((TB, 1), lambda i: (i, 0)),
        ],
        out_specs=(
            pl.BlockSpec(memory_space=pltpu.MemorySpace.SMEM),
            pl.BlockSpec(memory_space=pltpu.MemorySpace.SMEM),
        ),
        scratch_shapes=[
            pltpu.VMEM((8, C), jnp.float32),   # loss partials
            pltpu.VMEM((8, 1), jnp.int32),     # correct-count partials
        ],
        compiler_params=pltpu.CompilerParams(
            dimension_semantics=("arbitrary",),
            vmem_limit_bytes=vmem_limit,
        ),
        cost_estimate=cost,
    )(pred, gold2d)   # pred stays in its native dtype (no HBM f32 copy).

    return loss[0, 0], correct[0, 0]


# ---------------------------------------------------------------------------
# Pure-JAX reference
# ---------------------------------------------------------------------------
def _reference(pred, gold):
    pred = pred.astype(jnp.float32)
    ref_loss = -jnp.sum(pred[jnp.arange(pred.shape[0]), gold])
    ref_correct = jnp.sum(jnp.argmax(pred, axis=-1).astype(jnp.int32)
                          == gold.astype(jnp.int32))
    return ref_loss, ref_correct


if __name__ == "__main__":
    key = jax.random.PRNGKey(0)
    k1, k2, k3, k4, k5, k6 = jax.random.split(key, 6)

    # Case 1: the module's shapes — batch_l=8 (shared.batch_l), num_label=5.
    batch_l, num_label = 8, 5
    logits = jax.random.normal(k1, (batch_l, num_label), dtype=jnp.float32)
    pred = jax.nn.log_softmax(logits, axis=-1)       # pred is already log-probs
    gold = jax.random.randint(k2, (batch_l,), 0, num_label, dtype=jnp.int32)

    loss, num_correct = multiclass_loss(pred, gold)
    jax.block_until_ready((loss, num_correct))
    ref_loss, ref_correct = _reference(pred, gold)
    assert jnp.allclose(loss, ref_loss, rtol=1e-5, atol=1e-5), (loss, ref_loss)
    assert int(num_correct) == int(ref_correct), (num_correct, ref_correct)

    # Case 2: ragged batch (B not a multiple of TB) + multi-step accumulation.
    batch_l2 = 13
    logits2 = jax.random.normal(k3, (batch_l2, num_label), dtype=jnp.float32)
    pred2 = jax.nn.log_softmax(logits2, axis=-1)
    gold2 = jax.random.randint(k4, (batch_l2,), 0, num_label, dtype=jnp.int32)

    loss2, num_correct2 = multiclass_loss(pred2, gold2, tb=8)
    jax.block_until_ready((loss2, num_correct2))
    ref_loss2, ref_correct2 = _reference(pred2, gold2)
    assert jnp.allclose(loss2, ref_loss2, rtol=1e-5, atol=1e-5), (loss2, ref_loss2)
    assert int(num_correct2) == int(ref_correct2), (num_correct2, ref_correct2)

    # Case 3: bf16 log-probs, multi-step grid with a masked ragged tail.
    B3, C3 = 300, 40
    logits3 = jax.random.normal(k5, (B3, C3), dtype=jnp.float32)
    pred3 = jax.nn.log_softmax(logits3, axis=-1).astype(jnp.bfloat16)
    gold3 = jax.random.randint(k6, (B3,), 0, C3, dtype=jnp.int32)

    loss3, num_correct3 = multiclass_loss(pred3, gold3, tb=64)
    jax.block_until_ready((loss3, num_correct3))
    ref_loss3, ref_correct3 = _reference(pred3, gold3)
    assert jnp.allclose(loss3, ref_loss3, rtol=1e-4, atol=1e-2), (loss3, ref_loss3)
    assert int(num_correct3) == int(ref_correct3), (num_correct3, ref_correct3)

    print("KERNEL_OK")
</pallas_src>

<mosaic_0001>
module attributes {stable_mosaic.version = 11 : i64} {
  func.func @_nll_kernel(%arg0: i32, %arg1: memref<8x5xf32, #tpu.memory_space<vmem>>, %arg2: memref<8x1xi32, #tpu.memory_space<vmem>>, %arg3: memref<1x1xf32, #tpu.memory_space<smem>>, %arg4: memref<1x1xi32, #tpu.memory_space<smem>>, %arg5: memref<8x5xf32, #tpu.memory_space<vmem>>, %arg6: memref<8x1xi32, #tpu.memory_space<vmem>>) attributes {dimension_semantics = [#tpu.dimension_semantics<arbitrary>], iteration_bounds = array<i64: 1>, scalar_prefetch = 0 : i64, scratch_operands = 2 : i64, tpu.core_type = #tpu.core_type<tc>, window_params = [{transform_indices = @transform_0, window_bounds = array<i64: 8, 5>}, {transform_indices = @transform_1, window_bounds = array<i64: 8, 1>}, {transform_indices = @transform_2, window_bounds = array<i64: 1, 1>}, {transform_indices = @transform_3, window_bounds = array<i64: 1, 1>}]} {
    %c0_i32 = arith.constant 0 : i32
    %0 = arith.cmpi eq, %arg0, %c0_i32 : i32
    %1 = arith.extui %0 : i1 to i32
    %c0_i32_0 = arith.constant 0 : i32
    %2 = arith.cmpi ne, %1, %c0_i32_0 : i32
    scf.if %2 {
      %cst_19 = arith.constant 0.000000e+00 : f32
      %42 = vector.broadcast %cst_19 : f32 to vector<8x5xf32>
      %c0_20 = arith.constant 0 : index
      %c0_21 = arith.constant 0 : index
      %43 = vector.load %arg5[%c0_20, %c0_21] : memref<8x5xf32, #tpu.memory_space<vmem>>, vector<8x5xf32>
      tpu.vector_store %arg5[%c0_20, %c0_21], %42 {strides = array<i32>} : memref<8x5xf32, #tpu.memory_space<vmem>>, vector<8x5xf32>,
      %c0_i32_22 = arith.constant 0 : i32
      %44 = vector.broadcast %c0_i32_22 : i32 to vector<8x1xi32>
      %c0_23 = arith.constant 0 : index
      %c0_24 = arith.constant 0 : index
      %45 = vector.load %arg6[%c0_23, %c0_24] : memref<8x1xi32, #tpu.memory_space<vmem>>, vector<8x1xi32>
      tpu.vector_store %arg6[%c0_23, %c0_24], %44 {strides = array<i32>} : memref<8x1xi32, #tpu.memory_space<vmem>>, vector<8x1xi32>,
    } else {
    }
    %c0 = arith.constant 0 : index
    %c0_1 = arith.constant 0 : index
    %3 = vector.load %arg1[%c0, %c0_1] : memref<8x5xf32, #tpu.memory_space<vmem>>, vector<8x5xf32>
    %c0_2 = arith.constant 0 : index
    %c0_3 = arith.constant 0 : index
    %4 = vector.load %arg2[%c0_2, %c0_3] : memref<8x1xi32, #tpu.memory_space<vmem>>, vector<8x1xi32>
    %5 = tpu.iota {dimensions = array<i32: 1>} : vector<8x5xi32>
    %6 = tpu.iota {dimensions = array<i32: 0>} : vector<8x1xi32>
    %c8_i32 = arith.constant 8 : i32
    %7 = arith.muli %arg0, %c8_i32 : i32
    %8 = vector.broadcast %7 : i32 to vector<8x1xi32>
    %9 = arith.addi %8, %6 : vector<8x1xi32>
    %c8_i32_4 = arith.constant 8 : i32
    %10 = vector.broadcast %c8_i32_4 : i32 to vector<8x1xi32>
    %11 = arith.cmpi slt, %9, %10 : vector<8x1xi32>
    %12 = vector.broadcast %4 : vector<8x1xi32> to vector<8x5xi32>
    %13 = arith.cmpi eq, %5, %12 : vector<8x5xi32>
    %14 = vector.broadcast %11 : vector<8x1xi1> to vector<8x5xi1>
    %15 = arith.andi %13, %14 : vector<8x5xi1>
    %cst = arith.constant 0.000000e+00 : f32
    %16 = vector.broadcast %cst : f32 to vector<8x5xf32>
    %17 = arith.select %15, %3, %16 : vector<8x5xi1>, vector<8x5xf32>
    %c0_5 = arith.constant 0 : index
    %c0_6 = arith.constant 0 : index
    %18 = vector.load %arg5[%c0_5, %c0_6] : memref<8x5xf32, #tpu.memory_space<vmem>>, vector<8x5xf32>
    %19 = vector.shape_cast %17 : vector<8x5xf32> to vector<1x8x5xf32>
    %cst_7 = arith.constant dense<0.000000e+00> : vector<8x5xf32>
    %20 = vector.multi_reduction <add>, %19, %cst_7 [0] : vector<1x8x5xf32> to vector<8x5xf32>
    %21 = arith.addf %18, %20 : vector<8x5xf32>
    %c0_8 = arith.constant 0 : index
    %c0_9 = arith.constant 0 : index
    %22 = vector.load %arg5[%c0_8, %c0_9] : memref<8x5xf32, #tpu.memory_space<vmem>>, vector<8x5xf32>
    tpu.vector_store %arg5[%c0_8, %c0_9], %21 {strides = array<i32>} : memref<8x5xf32, #tpu.memory_space<vmem>>, vector<8x5xf32>,
    %cst_10 = arith.constant dense<0xFF800000> : vector<8xf32>
    %23 = vector.multi_reduction <maximumf>, %3, %cst_10 [1] : vector<8x5xf32> to vector<8xf32>
    %24 = vector.shape_cast %23 : vector<8xf32> to vector<8x1xf32>
    %25 = vector.broadcast %24 : vector<8x1xf32> to vector<8x5xf32>
    %26 = arith.cmpf oeq, %3, %25 : vector<8x5xf32>
    %c5_i32 = arith.constant 5 : i32
    %27 = vector.broadcast %c5_i32 : i32 to vector<8x5xi32>
    %28 = arith.select %26, %5, %27 : vector<8x5xi1>, vector<8x5xi32>
    %cst_11 = arith.constant dense<2147483647> : vector<8xi32>
    %29 = vector.multi_reduction <minsi>, %28, %cst_11 [1] : vector<8x5xi32> to vector<8xi32>
    %30 = vector.shape_cast %29 : vector<8xi32> to vector<8x1xi32>
    %31 = arith.cmpi eq, %30, %4 : vector<8x1xi32>
    %32 = arith.andi %31, %11 : vector<8x1xi1>
    %33 = arith.extui %32 : vector<8x1xi1> to vector<8x1xi32>
    %c0_12 = arith.constant 0 : index
    %c0_13 = arith.constant 0 : index
    %34 = vector.load %arg6[%c0_12, %c0_13] : memref<8x1xi32, #tpu.memory_space<vmem>>, vector<8x1xi32>
    %35 = vector.shape_cast %33 : vector<8x1xi32> to vector<1x8x1xi32>
    %cst_14 = arith.constant dense<0> : vector<8x1xi32>
    %36 = vector.multi_reduction <add>, %35, %cst_14 [0] : vector<1x8x1xi32> to vector<8x1xi32>
    %37 = arith.addi %34, %36 : vector<8x1xi32>
    %c0_15 = arith.constant 0 : index
    %c0_16 = arith.constant 0 : index
    %38 = vector.load %arg6[%c0_15, %c0_16] : memref<8x1xi32, #tpu.memory_space<vmem>>, vector<8x1xi32>
    tpu.vector_store %arg6[%c0_15, %c0_16], %37 {strides = array<i32>} : memref<8x1xi32, #tpu.memory_space<vmem>>, vector<8x1xi32>,
    %c0_i32_17 = arith.constant 0 : i32
    %39 = arith.cmpi eq, %arg0, %c0_i32_17 : i32
    %40 = arith.extui %39 : i1 to i32
    %c0_i32_18 = arith.constant 0 : i32
    %41 = arith.cmpi ne, %40, %c0_i32_18 : i32
    scf.if %41 {
      %c0_19 = arith.constant 0 : index
      %c0_20 = arith.constant 0 : index
      %42 = vector.load %arg5[%c0_19, %c0_20] : memref<8x5xf32, #tpu.memory_space<vmem>>, vector<8x5xf32>
      %43 = vector.shape_cast %42 : vector<8x5xf32> to vector<1x8x5xf32>
      %cst_21 = arith.constant dense<0.000000e+00> : vector<1xf32>
      %44 = vector.multi_reduction <add>, %43, %cst_21 [1, 2] : vector<1x8x5xf32> to vector<1xf32>
      %45 = vector.shape_cast %44 : vector<1xf32> to vector<1x1x1xf32>
      %46 = vector.extract %45[0, 0, 0] : f32 from vector<1x1x1xf32>
      %cst_22 = arith.constant 0.000000e+00 : f32
      %47 = arith.subf %cst_22, %46 : f32
      %c0_23 = arith.constant 0 : index
      %c0_24 = arith.constant 0 : index
      %48 = memref.load %arg3[%c0_23, %c0_24] : memref<1x1xf32, #tpu.memory_space<smem>>
      memref.store %47, %arg3[%c0_23, %c0_24] : memref<1x1xf32, #tpu.memory_space<smem>>
      %c0_25 = arith.constant 0 : index
      %c0_26 = arith.constant 0 : index
      %49 = vector.load %arg6[%c0_25, %c0_26] : memref<8x1xi32, #tpu.memory_space<vmem>>, vector<8x1xi32>
      %50 = vector.shape_cast %49 : vector<8x1xi32> to vector<1x8x1xi32>
      %cst_27 = arith.constant dense<0> : vector<1xi32>
      %51 = vector.multi_reduction <add>, %50, %cst_27 [1, 2] : vector<1x8x1xi32> to vector<1xi32>
      %52 = vector.shape_cast %51 : vector<1xi32> to vector<1x1x1xi32>
      %53 = vector.extract %52[0, 0, 0] : i32 from vector<1x1x1xi32>
      %c0_28 = arith.constant 0 : index
      %c0_29 = arith.constant 0 : index
      %54 = memref.load %arg4[%c0_28, %c0_29] : memref<1x1xi32, #tpu.memory_space<smem>>
      memref.store %53, %arg4[%c0_28, %c0_29] : memref<1x1xi32, #tpu.memory_space<smem>>
    } else {
    }
    return
  }
  func.func @transform_0(%arg0: i32) -> (i32, i32) {
    %c0_i32 = arith.constant 0 : i32
    %c0_i32_0 = arith.constant 0 : i32
    return %arg0, %c0_i32 : i32, i32
  }
  func.func @transform_1(%arg0: i32) -> (i32, i32) {
    %c0_i32 = arith.constant 0 : i32
    %c0_i32_0 = arith.constant 0 : i32
    return %arg0, %c0_i32 : i32, i32
  }
  func.func @transform_2(%arg0: i32) -> (i32, i32) {
    %c0_i32 = arith.constant 0 : i32
    %c0_i32_0 = arith.constant 0 : i32
    %c0_i32_1 = arith.constant 0 : i32
    return %c0_i32, %c0_i32_0 : i32, i32
  }
  func.func @transform_3(%arg0: i32) -> (i32, i32) {
    %c0_i32 = arith.constant 0 : i32
    %c0_i32_0 = arith.constant 0 : i32
    %c0_i32_1 = arith.constant 0 : i32
    return %c0_i32, %c0_i32_0 : i32, i32
  }
}

</mosaic_0001>

<bundles_post_ra>
// kernel: tpu_custom_call.1
= control target key start
LH: loop header
LB: loop body
LE: loop exit
PB: predicated region body
PF: predicated region fallthrough
CT: control target
= control target key end

     0   :  { %9 = vsyncpa [#allocation5], 0  ;;  %vm19_vm0 = vcmask 39936   ;;  %s221_s0 = inlined_call_operand.vmem [shape: f32[8,5], index: 0, kind: input, shape index: {}]   ;;  %s222_s1 = inlined_call_operand.vmem [shape: s32[8,1], index: 1, kind: input, shape index: {}]   ;;  %s223_s2 = inlined_call_operand.hbm [shape: f32[1,1], index: 2, kind: output, shape index: {0}]   ;;  %s224_s3 = inlined_call_operand.hbm [shape: s32[1,1], index: 3, kind: output, shape index: {1}]  }
   0x1   :  { %v23_v0 = vld [vmem:[%s221_s0] sm:$0xff] }
   0x2   :  { %10 = vsyncpa [#allocation7], 0  ;;  %v46_v1 = vsel %vm19_vm0, %v23_v0, -inf  ;;  %v25_v2 = vlaneseq  ;;  %v180_v9 = vmov 0   ;;  %v24_v14 = vld [vmem:[%s222_s1] sm:$0xff]  ;;  %vm21_vm3 = vcmask 7168  }
   0x3   :  { %47 = vmax.xlane.f32.xlu0 %v46_v1  ;;  %150 = vset.pattern.permute.xlu1 %v180_v9  ;;  %22 = vst.msk [vmem:[#allocation3] sm:$0xff] %vm21_vm3, %v180_v9  ;;  %v181_v15 = vmov 0.0   ;;  %s118_s16 = sshll.u32 %s223_s2, 4  ;;  %s127_s19 = sshll.u32 %s224_s3, 4  ;;  %s119_s16 = int_to_ptr.hbm [resolvable:$true] %s118_s16  ;;  %s128_s19 = int_to_ptr.hbm [resolvable:$true] %s127_s19 }
   0x4   :  { %v26_v3 = vand.u32 127, %v25_v2  ;;  %151 = vset.pattern.permute.xlu0 %v180_v9  ;;  %20 = vst.msk [vmem:[#allocation2] sm:$0xff] %vm19_vm0, %v181_v15  ;;  %s182_s23 = smov [#allocation4]   ;;  %s183_s24 = smov [#allocation6]  }
   0xa   :  { %v69_v21 = vld [vmem:[#allocation3] sm:$0xff] }
   0xb   :  { %v41_v29 = vld [vmem:[#allocation2] sm:$0xff] }
  0x76   :  { %v48_v4 = vpop.xlane.xlu0 %47 }
  0x77   :  { %vm49_vm1 = vcmp.eq.f32.partialorder %v23_v0, %v48_v4 }
  0x78   :  { %v50_v5 = vsel %vm49_vm1, %v26_v3, 5 }
  0x79   :  { %v51_v6 = vsel %vm19_vm0, %v50_v5, 2147483647 }
  0x7a   :  { %v53_v7 = vshra.s32 %v51_v6, 16  ;;  %v52_v10 = vand.u32 65535, %v51_v6 }
  0x7c   :  { %v55_v8 = vcvt.s32.f32 %v53_v7  ;;  %v54_v12 = vcvt.s32.f32 %v52_v10 }
  0x7e   :  { %56 = vmin.xlane.f32.xlu0 %v55_v8 }
  0xf1   :  { %v57_v11 = vpop.xlane.xlu0 %56 }
  0xf2   :  { %vm58_vm2 = vcmp.eq.f32.partialorder %v55_v8, %v57_v11  ;;  %v63_v16 = vcvt.f32.s32 %v57_v11 }
  0xf3   :  { %v59_v13 = vsel %vm58_vm2, %v54_v12, inf }
  0xf4   :  { %60 = vmin.xlane.f32.xlu1 %v59_v13  ;;  %v64_v18 = vshll.u32 %v63_v16, 16 }
 0x10d   :  { %34 = vperm.xlu1 %150, %v24_v14  }
 0x167   :  { %v61_v17 = vpop.xlane.xlu1 %60 }
 0x168   :  { %v62_v19 = vcvt.f32.s32 %v61_v17 }
 0x16a   :  { %v65_v20 = vadd.s32 %v64_v18, %v62_v19 }
 0x16c   :  { %vm66_vm4 = vcmp.eq.s32.totalorder %v65_v20, %v24_v14 }
 0x16d   :  { %v68_v22 = vsel %vm66_vm4, 1, %v180_v9 }
 0x16e   :  { %v70_v23 = vadd.s32 %v69_v21, %v68_v22 }
 0x170   :  { %72 = vst.msk [vmem:[#allocation3] sm:$0xff] %vm21_vm3, %v70_v23 }
 0x177   :  { %v90_v24 = vld [vmem:[#allocation3] sm:$0xff] }
 0x178   :  { %v91_v25 = vsel %vm21_vm3, %v90_v24, 0 }
 0x179   :  { %v93_v26 = vshrl.u32 %v91_v25, 16  ;;  %v92_v30 = vand.u32 65535, %v91_v25 }
 0x17b   :  { %v95_v27 = vcvt.s32.f32 %v93_v26  ;;  %v94_v33 = vcvt.s32.f32 %v92_v30 }
 0x17d   :  { %98 = vadd.xlane.f32.xlu2 %v95_v27 }
 0x17f   :  { %v35_v28 = vpop.permute.xlu1 %34 }
 0x180   :  { %vm36_vm5 = vcmp.eq.s32.totalorder %v26_v3, %v35_v28 }
 0x181   :  { %v40_v31 = vsel %vm36_vm5, %v23_v0, 0.0 }
 0x182   :  { %v43_v32 = vadd.f32 %v41_v29, %v40_v31 }
 0x184   :  { %45 = vst.msk [vmem:[#allocation2] sm:$0xff] %vm19_vm0, %v43_v32 }
 0x185   :  { %96 = vadd.xlane.f32.xlu2 %v94_v33 }
 0x18b   :  { %v76_v34 = vld [vmem:[#allocation2] sm:$0xff] }
 0x18c   :  { %v77_v35 = vsel %vm19_vm0, %v76_v34, 0.0 }
 0x18d   :  { %78 = vadd.xlane.f32.xlu0 %v77_v35 }
 0x1f0   :  { %v99_v36 = vpop.xlane.xlu2 %98 }
 0x1f1   :  { %v101_v37 = vcvt.f32.s32 %v99_v36 }
 0x1f3   :  { %v102_v39 = vshll.u32 %v101_v37, 16 }
 0x1f8   :  { %v97_v38 = vpop.xlane.xlu2 %96 }
 0x1f9   :  { %v100_v40 = vcvt.f32.s32 %v97_v38 }
 0x1fb   :  { %v103_v41 = vadd.s32 %v102_v39, %v100_v40 }
 0x1fd   :  { %v104_v42 = vrot.slane %v103_v41, 4 }
 0x1ff   :  { %v105_v43 = vadd.s32 %v104_v42, %v103_v41 }
 0x200   :  { %v79_v44 = vpop.xlane.xlu0 %78 }
 0x201   :  { %v80_v45 = vrot.slane %v79_v44, 4  ;;  %v106_v46 = vrot.slane %v105_v43, 2 }
 0x203   :  { %v81_v47 = vadd.f32 %v80_v45, %v79_v44  ;;  %v107_v48 = vadd.s32 %v106_v46, %v105_v43 }
 0x205   :  { %v82_v49 = vrot.slane %v81_v47, 2  ;;  %v108_v51 = vrot.slane %v107_v48, 1 }
 0x207   :  { %v83_v50 = vadd.f32 %v82_v49, %v81_v47  ;;  %v109_v54 = vadd.s32 %v108_v51, %v107_v48 }
 0x209   :  { %v84_v52 = vrot.slane %v83_v50, 1 }
 0x20b   :  { %v85_v53 = vadd.f32 %v84_v52, %v83_v50 }
 0x20d   :  { %142 = vpush %v85_v53 }
 0x20e   :  { %144 = vpush %v109_v54 }
 0x23e   :  { %s143_s20 = spop %142 }
 0x23f   :  { %s87_s21 = ssub.f32 0.0, %s143_s20  ;;  %s145_s22 = spop %144 }
 0x240   :  { %112 = sst [smem:[#allocation6]] %s145_s22 }
 0x241   :  { %89 = sst [smem:[#allocation4]] %s87_s21 }
 0x242   :  { %121 = dma.smem_to_hbm %s182_s23, 16, %s119_s16, [#allocation5]  }
 0x243   :  { %130 = dma.smem_to_hbm %s183_s24, 16, %s128_s19, [#allocation7]  }
 0x244   :  { %176 = dma.done.wait [#allocation5], 16  }
 0x245   :  { %177 = vsyncadd [#allocation5], 4294967280 }
 0x246   :  { %178 = dma.done.wait [#allocation7], 16  }
 0x247   :  { %179 = vsyncadd [#allocation7], 4294967280 }
 0x248   :  { %139 = sfence }
 0x249   :  { %140 = vsyncpa [#allocation5], 1 }
 0x24a   :  { %141 = vsyncpa [#allocation7], 1 }

</bundles_post_ra>
